<compile_context>
chip_gen: v7x
topology: tpu7x:2x2x1
jax: 0.10.0
libtpu: 0.0.40
codegen_flags: <defaults>
</compile_context>

<pallas_src>
import math
from functools import partial

import jax
import jax.numpy as jnp
from jax.experimental import pallas as pl
from jax.experimental.pallas import tpu as pltpu


def _segment_correlation_kernel(q_ref, k_ref, v_ref, o_ref, *, scale, seg_len):
    """One (batch, M-tile) grid step.

    q_ref: (Mt, L_s, F)   k_ref / v_ref: (N, L_s, F)   o_ref: (Mt, L_s, F)
    F = H*D is the fused lane axis; the per-(h, d) math of the module is fully
    independent, so fusing (h, d) -> f is exact.
    """
    Mt = q_ref.shape[0]
    N = k_ref.shape[0]
    F = q_ref.shape[2]

    # scores[m, n, f] = scale * sum_l q[m, l, f] * k[n, l, f]
    # Accumulate over the small static segment length (factor) instead of
    # materializing an (Mt, N, L_s, F) broadcast.  scale is folded into the q
    # slices (Mt*L_s*F muls instead of Mt*N*F).
    scores = jnp.zeros((Mt, N, F), dtype=jnp.float32)
    for l in range(seg_len):            # factor: small & static -> unrolled
        q_l = q_ref[:, l, :].astype(jnp.float32) * jnp.float32(scale)  # (Mt, F)
        k_l = k_ref[:, l, :].astype(jnp.float32)                       # (N, F)
        scores = scores + q_l[:, None, :] * k_l[None, :, :]

    # Softmax over n (axis=1 == dim=-2 of the (b,h,m,n,d) scores) with
    # DEFERRED normalization: keep e un-normalized and divide the final
    # (Mt, L_s, F) output once (saves an Mt*N*F multiply and a full-size
    # live temp; the VALU slot is the binding resource here).
    s_max = jnp.max(scores, axis=1, keepdims=True)                     # (Mt, 1, F)
    e = jnp.exp(scores - s_max)                                        # (Mt, N, F)
    inv_denom = pl.reciprocal(jnp.sum(e, axis=1, keepdims=True),
                              approx=True)                             # (Mt, 1, F)

    # out[m, l, f] = (sum_n e[m, n, f] * v[n, l, f]) * inv_denom[m, f]
    out_slices = []
    for l in range(seg_len):
        v_l = v_ref[:, l, :].astype(jnp.float32)                       # (N, F)
        out_slices.append(jnp.sum(e * v_l[None, :, :], axis=1))        # (Mt, F)
    acc = jnp.stack(out_slices, axis=1)                                # (Mt, L_s, F)

    # Single lane-dense store (no per-l masked sub-sublane stores).
    o_ref[...] = (acc * inv_denom).astype(o_ref.dtype)
    # TODO(synk): if factor (L_s) is ever >= ~64-128, switch the scores/out
    # loops to an MXU dot_general formulation; and for sequences where the
    # resident K/V blocks would exceed VMEM, add an N grid axis ("arbitrary",
    # last) with an online-softmax accumulator.  For typical small factors and
    # sequence lengths the VPU / resident-K/V formulation is right.


def _trim(queries, keys, values, L_s, head_flag):
    B, L_q, H, D = queries.shape
    L_v = values.shape[1]
    add_q = L_q % L_s
    add_v = L_v % L_s
    if head_flag:
        q = queries[:, add_q:]
        k = keys[:, add_v:]
        v = values[:, add_v:]
        # NOTE: matches the PyTorch code exactly — addition_Q is taken from the
        # already-trimmed queries (original rows add_q : 2*add_q).
        addition_Q = q[:, :add_q] if add_q != 0 else None
    else:
        q = queries[:, :L_q - add_q] if add_q != 0 else queries
        k = keys[:, :L_v - add_v] if add_v != 0 else keys
        v = values[:, :L_v - add_v] if add_v != 0 else values
        addition_Q = q[:, q.shape[1] - add_q:] if add_q != 0 else None
    return q, k, v, addition_Q


def _pick_m_tile(B, M, N, L_s, F, itemsize):
    """VMEM-budget-aware M tile.

    No divisor-of-M requirement: the grid uses pl.cdiv and Pallas masks the
    ragged tail.  The budget counts the double-buffered q/out blocks, the
    resident double-buffered K/V blocks, and the f32 in-kernel temporaries.
    """
    budget = 40 * 1024 * 1024
    kv_bytes = 2 * 2 * N * L_s * F * itemsize       # K + V blocks, x2 buffers
    avail = max(budget - kv_bytes, 1 << 20)
    per_row = (2 * 2 * L_s * F * itemsize           # q + out blocks, x2 buffers
               + 2 * N * F * 4                      # scores + e f32 temps
               + L_s * F * 4)                       # f32 output accumulator
    cap = max(8, avail // per_row)                  # >=8 rows amortizes ~0.35us/step
    m_tile = int(min(M, cap))
    # Make sure there are >=2 grid steps so both TensorCores get work on
    # megacore parts (v7x) when the batch alone doesn't provide it.
    if B * pl.cdiv(M, m_tile) < 2 and M >= 2:
        m_tile = int(pl.cdiv(M, 2))
    return m_tile


def segment_correlation(queries, keys, values, *, factor=1, scale=None,
                        head_flag=True, m_tile=None):
    B, L_q, H, D_q = queries.shape
    _, L_k, _, D_k = keys.shape
    _, L_v, _, D_v = values.shape
    L_s = factor
    scale_val = scale if scale is not None else 1.0 / math.sqrt(L_s)
    assert L_k == L_v
    assert D_q == D_k == D_v
    assert L_s <= L_q and L_s <= L_v

    q, k, v, addition_Q = _trim(queries, keys, values, L_s, head_flag)
    M = q.shape[1] // L_s
    N = v.shape[1] // L_s
    D = D_q
    F = H * D                                     # fused lane axis

    # Contiguous reshapes only (no HBM transposes):
    # (B, M*L_s, H, D) -> (B, M, L_s, H*D)
    qf = q.reshape(B, M, L_s, F)
    kf = k.reshape(B, N, L_s, F)
    vf = v.reshape(B, N, L_s, F)

    itemsize = jnp.dtype(queries.dtype).itemsize
    if m_tile is None:
        m_tile = _pick_m_tile(B, M, N, L_s, F, itemsize)
    m_tile = int(min(m_tile, M))
    num_m = int(pl.cdiv(M, m_tile))

    # VMEM footprint estimate -> explicit limit, capped at 48 MiB (headroom on
    # v7x's 64 MiB physical VMEM, well above v5e's 16 MiB scoped default).
    est = (2 * 2 * m_tile * L_s * F * itemsize        # q + out blocks (x2 buf)
           + 2 * 2 * N * L_s * F * itemsize           # k + v blocks (x2 buf)
           + (2 * m_tile * N * F + m_tile * L_s * F) * 4)
    vmem_limit = int(min(48 * 1024 * 1024,
                         max(32 * 1024 * 1024, int(est * 1.5))))

    kernel = partial(_segment_correlation_kernel, scale=scale_val, seg_len=L_s)
    # NOTE: keep the grid order (B outer, mi inner).  The K/V block index is
    # constant across consecutive mi steps, so Pallas skips re-DMA of K/V;
    # swapping the axes would re-fetch K/V from HBM every step.
    out = pl.pallas_call(
        kernel,
        out_shape=jax.ShapeDtypeStruct((B, M, L_s, F), queries.dtype),
        grid=(B, num_m),
        in_specs=[
            pl.BlockSpec((None, m_tile, L_s, F), lambda b, mi: (b, mi, 0, 0)),
            pl.BlockSpec((None, N, L_s, F), lambda b, mi: (b, 0, 0, 0)),
            pl.BlockSpec((None, N, L_s, F), lambda b, mi: (b, 0, 0, 0)),
        ],
        out_specs=pl.BlockSpec((None, m_tile, L_s, F),
                               lambda b, mi: (b, mi, 0, 0)),
        compiler_params=pltpu.CompilerParams(
            dimension_semantics=("parallel", "parallel"),
            vmem_limit_bytes=vmem_limit),
    )(qf, kf, vf)

    # (B, M, L_s, F) -> (B, M*L_s, H, D): contiguous reshape, no relayout.
    V = out.reshape(B, M * L_s, H, D)

    if head_flag:
        if addition_Q is not None:
            V = jnp.concatenate([addition_Q, V], axis=1)
    else:
        if addition_Q is not None:
            V = jnp.concatenate([V, addition_Q], axis=1)
    return V


def segment_correlation_ref(queries, keys, values, *, factor=1, scale=None,
                            head_flag=True):
    """Pure-JAX reference mirroring the PyTorch forward (for validation)."""
    B, L_q, H, D = queries.shape
    L_s = factor
    scale_val = scale if scale is not None else 1.0 / math.sqrt(L_s)
    q, k, v, addition_Q = _trim(queries, keys, values, L_s, head_flag)
    sq = q.reshape(B, -1, L_s, H, D)
    sk = k.reshape(B, -1, L_s, H, D)
    sv = v.reshape(B, -1, L_s, H, D)
    scores = jnp.einsum('bmlhd,bnlhd->bhmnd', sq, sk)
    A = jax.nn.softmax(scale_val * scores, axis=-2)
    V = jnp.einsum('bhmnd,bnlhd->bmlhd', A, sv).reshape(B, -1, H, D)
    if head_flag:
        if addition_Q is not None:
            V = jnp.concatenate([addition_Q, V], axis=1)
    else:
        if addition_Q is not None:
            V = jnp.concatenate([V, addition_Q], axis=1)
    return V


if __name__ == "__main__":
    key = jax.random.PRNGKey(0)
    # F = H*D = 128 -> fully lane-dense; L % factor != 0 exercises remainder.
    B, L, H, D = 2, 18, 4, 32
    kq, kk, kv = jax.random.split(key, 3)
    q = jax.random.normal(kq, (B, L, H, D), dtype=jnp.float32)
    k = jax.random.normal(kk, (B, L, H, D), dtype=jnp.float32)
    v = jax.random.normal(kv, (B, L, H, D), dtype=jnp.float32)

    cases = [
        dict(factor=4, head_flag=True, m_tile=None),
        dict(factor=4, head_flag=False, m_tile=None),
        dict(factor=1, head_flag=True, m_tile=None),
        # ragged M-tile path (cdiv grid with a masked tail block)
        dict(factor=4, head_flag=True, m_tile=3),
    ]
    for c in cases:
        out = segment_correlation(q, k, v, factor=c["factor"],
                                  head_flag=c["head_flag"], m_tile=c["m_tile"])
        out = jax.block_until_ready(out)
        ref = segment_correlation_ref(q, k, v, factor=c["factor"],
                                      head_flag=c["head_flag"])
        assert out.shape == ref.shape == (B, L, H, D), (out.shape, ref.shape)
        err = float(jnp.max(jnp.abs(out - ref)))
        # Loose-ish tolerance: the deferred softmax normalization uses the EUP
        # approximate reciprocal (pl.reciprocal(approx=True)).
        assert err < 1e-2, (c, err)

    print("KERNEL_OK")
</pallas_src>

<mosaic_0001>
module attributes {stable_mosaic.version = 11 : i64} {
  func.func @_segment_correlation_kernel(%arg0: i32, %arg1: i32, %arg2: memref<1x4x4x128xf32, #tpu.memory_space<vmem>>, %arg3: memref<1x4x4x128xf32, #tpu.memory_space<vmem>>, %arg4: memref<1x4x4x128xf32, #tpu.memory_space<vmem>>, %arg5: memref<1x4x4x128xf32, #tpu.memory_space<vmem>>) attributes {dimension_semantics = [#tpu.dimension_semantics<parallel>, #tpu.dimension_semantics<parallel>], iteration_bounds = array<i64: 2, 1>, scalar_prefetch = 0 : i64, scratch_operands = 0 : i64, tpu.core_type = #tpu.core_type<tc>, window_params = [{transform_indices = @transform_0, window_bounds = array<i64: 1, 4, 4, 128>}, {transform_indices = @transform_1, window_bounds = array<i64: 1, 4, 4, 128>}, {transform_indices = @transform_2, window_bounds = array<i64: 1, 4, 4, 128>}, {transform_indices = @transform_3, window_bounds = array<i64: 1, 4, 4, 128>}]} {
    %cst = arith.constant 0.000000e+00 : f32
    %0 = vector.broadcast %cst : f32 to vector<4x4x128xf32>
    %c0 = arith.constant 0 : index
    %c0_0 = arith.constant 0 : index
    %c0_1 = arith.constant 0 : index
    %c0_2 = arith.constant 0 : index
    %1 = vector.load %arg2[%c0, %c0_0, %c0_1, %c0_2] : memref<1x4x4x128xf32, #tpu.memory_space<vmem>>, vector<1x4x1x128xf32>
    %2 = vector.shape_cast %1 : vector<1x4x1x128xf32> to vector<4x128xf32>
    %cst_3 = arith.constant 5.000000e-01 : f32
    %3 = vector.broadcast %cst_3 : f32 to vector<4x128xf32>
    %4 = arith.mulf %2, %3 : vector<4x128xf32>
    %c0_4 = arith.constant 0 : index
    %c0_5 = arith.constant 0 : index
    %c0_6 = arith.constant 0 : index
    %c0_7 = arith.constant 0 : index
    %5 = vector.load %arg3[%c0_4, %c0_5, %c0_6, %c0_7] : memref<1x4x4x128xf32, #tpu.memory_space<vmem>>, vector<1x4x1x128xf32>
    %6 = vector.shape_cast %5 : vector<1x4x1x128xf32> to vector<4x128xf32>
    %7 = vector.shape_cast %4 : vector<4x128xf32> to vector<4x1x128xf32>
    %8 = vector.shape_cast %6 : vector<4x128xf32> to vector<1x4x128xf32>
    %9 = vector.broadcast %7 : vector<4x1x128xf32> to vector<4x4x128xf32>
    %10 = vector.broadcast %8 : vector<1x4x128xf32> to vector<4x4x128xf32>
    %11 = arith.mulf %9, %10 : vector<4x4x128xf32>
    %12 = arith.addf %0, %11 : vector<4x4x128xf32>
    %c0_8 = arith.constant 0 : index
    %c0_9 = arith.constant 0 : index
    %c1 = arith.constant 1 : index
    %c0_10 = arith.constant 0 : index
    %13 = vector.load %arg2[%c0_8, %c0_9, %c1, %c0_10] : memref<1x4x4x128xf32, #tpu.memory_space<vmem>>, vector<1x4x1x128xf32>
    %14 = vector.shape_cast %13 : vector<1x4x1x128xf32> to vector<4x128xf32>
    %cst_11 = arith.constant 5.000000e-01 : f32
    %15 = vector.broadcast %cst_11 : f32 to vector<4x128xf32>
    %16 = arith.mulf %14, %15 : vector<4x128xf32>
    %c0_12 = arith.constant 0 : index
    %c0_13 = arith.constant 0 : index
    %c1_14 = arith.constant 1 : index
    %c0_15 = arith.constant 0 : index
    %17 = vector.load %arg3[%c0_12, %c0_13, %c1_14, %c0_15] : memref<1x4x4x128xf32, #tpu.memory_space<vmem>>, vector<1x4x1x128xf32>
    %18 = vector.shape_cast %17 : vector<1x4x1x128xf32> to vector<4x128xf32>
    %19 = vector.shape_cast %16 : vector<4x128xf32> to vector<4x1x128xf32>
    %20 = vector.shape_cast %18 : vector<4x128xf32> to vector<1x4x128xf32>
    %21 = vector.broadcast %19 : vector<4x1x128xf32> to vector<4x4x128xf32>
    %22 = vector.broadcast %20 : vector<1x4x128xf32> to vector<4x4x128xf32>
    %23 = arith.mulf %21, %22 : vector<4x4x128xf32>
    %24 = arith.addf %12, %23 : vector<4x4x128xf32>
    %c0_16 = arith.constant 0 : index
    %c0_17 = arith.constant 0 : index
    %c2 = arith.constant 2 : index
    %c0_18 = arith.constant 0 : index
    %25 = vector.load %arg2[%c0_16, %c0_17, %c2, %c0_18] : memref<1x4x4x128xf32, #tpu.memory_space<vmem>>, vector<1x4x1x128xf32>
    %26 = vector.shape_cast %25 : vector<1x4x1x128xf32> to vector<4x128xf32>
    %cst_19 = arith.constant 5.000000e-01 : f32
    %27 = vector.broadcast %cst_19 : f32 to vector<4x128xf32>
    %28 = arith.mulf %26, %27 : vector<4x128xf32>
    %c0_20 = arith.constant 0 : index
    %c0_21 = arith.constant 0 : index
    %c2_22 = arith.constant 2 : index
    %c0_23 = arith.constant 0 : index
    %29 = vector.load %arg3[%c0_20, %c0_21, %c2_22, %c0_23] : memref<1x4x4x128xf32, #tpu.memory_space<vmem>>, vector<1x4x1x128xf32>
    %30 = vector.shape_cast %29 : vector<1x4x1x128xf32> to vector<4x128xf32>
    %31 = vector.shape_cast %28 : vector<4x128xf32> to vector<4x1x128xf32>
    %32 = vector.shape_cast %30 : vector<4x128xf32> to vector<1x4x128xf32>
    %33 = vector.broadcast %31 : vector<4x1x128xf32> to vector<4x4x128xf32>
    %34 = vector.broadcast %32 : vector<1x4x128xf32> to vector<4x4x128xf32>
    %35 = arith.mulf %33, %34 : vector<4x4x128xf32>
    %36 = arith.addf %24, %35 : vector<4x4x128xf32>
    %c0_24 = arith.constant 0 : index
    %c0_25 = arith.constant 0 : index
    %c3 = arith.constant 3 : index
    %c0_26 = arith.constant 0 : index
    %37 = vector.load %arg2[%c0_24, %c0_25, %c3, %c0_26] : memref<1x4x4x128xf32, #tpu.memory_space<vmem>>, vector<1x4x1x128xf32>
    %38 = vector.shape_cast %37 : vector<1x4x1x128xf32> to vector<4x128xf32>
    %cst_27 = arith.constant 5.000000e-01 : f32
    %39 = vector.broadcast %cst_27 : f32 to vector<4x128xf32>
    %40 = arith.mulf %38, %39 : vector<4x128xf32>
    %c0_28 = arith.constant 0 : index
    %c0_29 = arith.constant 0 : index
    %c3_30 = arith.constant 3 : index
    %c0_31 = arith.constant 0 : index
    %41 = vector.load %arg3[%c0_28, %c0_29, %c3_30, %c0_31] : memref<1x4x4x128xf32, #tpu.memory_space<vmem>>, vector<1x4x1x128xf32>
    %42 = vector.shape_cast %41 : vector<1x4x1x128xf32> to vector<4x128xf32>
    %43 = vector.shape_cast %40 : vector<4x128xf32> to vector<4x1x128xf32>
    %44 = vector.shape_cast %42 : vector<4x128xf32> to vector<1x4x128xf32>
    %45 = vector.broadcast %43 : vector<4x1x128xf32> to vector<4x4x128xf32>
    %46 = vector.broadcast %44 : vector<1x4x128xf32> to vector<4x4x128xf32>
    %47 = arith.mulf %45, %46 : vector<4x4x128xf32>
    %48 = arith.addf %36, %47 : vector<4x4x128xf32>
    %cst_32 = arith.constant dense<0xFF800000> : vector<4x128xf32>
    %49 = vector.multi_reduction <maximumf>, %48, %cst_32 [1] : vector<4x4x128xf32> to vector<4x128xf32>
    %50 = vector.shape_cast %49 : vector<4x128xf32> to vector<4x1x128xf32>
    %51 = vector.broadcast %50 : vector<4x1x128xf32> to vector<4x4x128xf32>
    %52 = arith.subf %48, %51 : vector<4x4x128xf32>
    %53 = math.exp %52 : vector<4x4x128xf32>
    %cst_33 = arith.constant dense<0.000000e+00> : vector<4x128xf32>
    %54 = vector.multi_reduction <add>, %53, %cst_33 [1] : vector<4x4x128xf32> to vector<4x128xf32>
    %55 = vector.shape_cast %54 : vector<4x128xf32> to vector<4x1x128xf32>
    %56 = tpu.reciprocal %55 {approx = true} : vector<4x1x128xf32> -> vector<4x1x128xf32>
    %c0_34 = arith.constant 0 : index
    %c0_35 = arith.constant 0 : index
    %c0_36 = arith.constant 0 : index
    %c0_37 = arith.constant 0 : index
    %57 = vector.load %arg4[%c0_34, %c0_35, %c0_36, %c0_37] : memref<1x4x4x128xf32, #tpu.memory_space<vmem>>, vector<1x4x1x128xf32>
    %58 = vector.shape_cast %57 : vector<1x4x1x128xf32> to vector<4x128xf32>
    %59 = vector.shape_cast %58 : vector<4x128xf32> to vector<1x4x128xf32>
    %60 = vector.broadcast %59 : vector<1x4x128xf32> to vector<4x4x128xf32>
    %61 = arith.mulf %53, %60 : vector<4x4x128xf32>
    %cst_38 = arith.constant dense<0.000000e+00> : vector<4x128xf32>
    %62 = vector.multi_reduction <add>, %61, %cst_38 [1] : vector<4x4x128xf32> to vector<4x128xf32>
    %c0_39 = arith.constant 0 : index
    %c0_40 = arith.constant 0 : index
    %c1_41 = arith.constant 1 : index
    %c0_42 = arith.constant 0 : index
    %63 = vector.load %arg4[%c0_39, %c0_40, %c1_41, %c0_42] : memref<1x4x4x128xf32, #tpu.memory_space<vmem>>, vector<1x4x1x128xf32>
    %64 = vector.shape_cast %63 : vector<1x4x1x128xf32> to vector<4x128xf32>
    %65 = vector.shape_cast %64 : vector<4x128xf32> to vector<1x4x128xf32>
    %66 = vector.broadcast %65 : vector<1x4x128xf32> to vector<4x4x128xf32>
    %67 = arith.mulf %53, %66 : vector<4x4x128xf32>
    %cst_43 = arith.constant dense<0.000000e+00> : vector<4x128xf32>
    %68 = vector.multi_reduction <add>, %67, %cst_43 [1] : vector<4x4x128xf32> to vector<4x128xf32>
    %c0_44 = arith.constant 0 : index
    %c0_45 = arith.constant 0 : index
    %c2_46 = arith.constant 2 : index
    %c0_47 = arith.constant 0 : index
    %69 = vector.load %arg4[%c0_44, %c0_45, %c2_46, %c0_47] : memref<1x4x4x128xf32, #tpu.memory_space<vmem>>, vector<1x4x1x128xf32>
    %70 = vector.shape_cast %69 : vector<1x4x1x128xf32> to vector<4x128xf32>
    %71 = vector.shape_cast %70 : vector<4x128xf32> to vector<1x4x128xf32>
    %72 = vector.broadcast %71 : vector<1x4x128xf32> to vector<4x4x128xf32>
    %73 = arith.mulf %53, %72 : vector<4x4x128xf32>
    %cst_48 = arith.constant dense<0.000000e+00> : vector<4x128xf32>
    %74 = vector.multi_reduction <add>, %73, %cst_48 [1] : vector<4x4x128xf32> to vector<4x128xf32>
    %c0_49 = arith.constant 0 : index
    %c0_50 = arith.constant 0 : index
    %c3_51 = arith.constant 3 : index
    %c0_52 = arith.constant 0 : index
    %75 = vector.load %arg4[%c0_49, %c0_50, %c3_51, %c0_52] : memref<1x4x4x128xf32, #tpu.memory_space<vmem>>, vector<1x4x1x128xf32>
    %76 = vector.shape_cast %75 : vector<1x4x1x128xf32> to vector<4x128xf32>
    %77 = vector.shape_cast %76 : vector<4x128xf32> to vector<1x4x128xf32>
    %78 = vector.broadcast %77 : vector<1x4x128xf32> to vector<4x4x128xf32>
    %79 = arith.mulf %53, %78 : vector<4x4x128xf32>
    %cst_53 = arith.constant dense<0.000000e+00> : vector<4x128xf32>
    %80 = vector.multi_reduction <add>, %79, %cst_53 [1] : vector<4x4x128xf32> to vector<4x128xf32>
    %81 = vector.shape_cast %62 : vector<4x128xf32> to vector<4x1x128xf32>
    %82 = vector.shape_cast %68 : vector<4x128xf32> to vector<4x1x128xf32>
    %83 = vector.shape_cast %74 : vector<4x128xf32> to vector<4x1x128xf32>
    %84 = vector.shape_cast %80 : vector<4x128xf32> to vector<4x1x128xf32>
    %85 = tpu.concatenate %81, %82, %83, %84 in 1 : vector<4x1x128xf32>, vector<4x1x128xf32>, vector<4x1x128xf32>, vector<4x1x128xf32> -> vector<4x4x128xf32>
    %86 = vector.broadcast %56 : vector<4x1x128xf32> to vector<4x4x128xf32>
    %87 = arith.mulf %85, %86 : vector<4x4x128xf32>
    %c0_54 = arith.constant 0 : index
    %c0_55 = arith.constant 0 : index
    %c0_56 = arith.constant 0 : index
    %c0_57 = arith.constant 0 : index
    %88 = vector.load %arg5[%c0_54, %c0_55, %c0_56, %c0_57] : memref<1x4x4x128xf32, #tpu.memory_space<vmem>>, vector<1x4x4x128xf32>
    %89 = vector.shape_cast %88 : vector<1x4x4x128xf32> to vector<4x4x128xf32>
    %90 = vector.shape_cast %87 : vector<4x4x128xf32> to vector<1x4x4x128xf32>
    tpu.vector_store %arg5[%c0_54, %c0_55, %c0_56, %c0_57], %90 {strides = array<i32>} : memref<1x4x4x128xf32, #tpu.memory_space<vmem>>, vector<1x4x4x128xf32>,
    return
  }
  func.func @transform_0(%arg0: i32, %arg1: i32) -> (i32, i32, i32, i32) {
    %c0_i32 = arith.constant 0 : i32
    %c0_i32_0 = arith.constant 0 : i32
    %c0_i32_1 = arith.constant 0 : i32
    return %arg0, %arg1, %c0_i32, %c0_i32_0 : i32, i32, i32, i32
  }
  func.func @transform_1(%arg0: i32, %arg1: i32) -> (i32, i32, i32, i32) {
    %c0_i32 = arith.constant 0 : i32
    %c0_i32_0 = arith.constant 0 : i32
    %c0_i32_1 = arith.constant 0 : i32
    %c0_i32_2 = arith.constant 0 : i32
    return %arg0, %c0_i32, %c0_i32_0, %c0_i32_1 : i32, i32, i32, i32
  }
  func.func @transform_2(%arg0: i32, %arg1: i32) -> (i32, i32, i32, i32) {
    %c0_i32 = arith.constant 0 : i32
    %c0_i32_0 = arith.constant 0 : i32
    %c0_i32_1 = arith.constant 0 : i32
    %c0_i32_2 = arith.constant 0 : i32
    return %arg0, %c0_i32, %c0_i32_0, %c0_i32_1 : i32, i32, i32, i32
  }
  func.func @transform_3(%arg0: i32, %arg1: i32) -> (i32, i32, i32, i32) {
    %c0_i32 = arith.constant 0 : i32
    %c0_i32_0 = arith.constant 0 : i32
    %c0_i32_1 = arith.constant 0 : i32
    return %arg0, %arg1, %c0_i32, %c0_i32_0 : i32, i32, i32, i32
  }
}

</mosaic_0001>

<bundles_post_ra>
// kernel: tpu_custom_call.1
= control target key start
LH: loop header
LB: loop body
LE: loop exit
PB: predicated region body
PF: predicated region fallthrough
CT: control target
= control target key end

     0   :  { %s1706_s0 = inlined_call_operand.hbm [shape: f32[2,4,4,128], index: 0, kind: input, shape index: {}]   ;;  %s1707_s1 = inlined_call_operand.hbm [shape: f32[2,4,4,128], index: 1, kind: input, shape index: {}]   ;;  %s1708_s2 = inlined_call_operand.hbm [shape: f32[2,4,4,128], index: 2, kind: input, shape index: {}]   ;;  %s1709_s3 = inlined_call_operand.hbm [shape: f32[2,4,4,128], index: 3, kind: output, shape index: {}]  }
   0x1   :  { %1719 = sst [smem:[#allocation15_spill]] %s1707_s1 }
   0x2   :  { %8 = vsyncpa [#allocation3], 0 }
   0x3   :  { %10 = vsyncpa [#allocation3 + $0x1], 0 }
   0x4   :  { %11 = vsyncpa [#allocation6], 0 }
   0x5   :  { %13 = vsyncpa [#allocation6 + $0x1], 0 }
   0x6   :  { %14 = vsyncpa [#allocation4], 0 }
   0x7   :  { %16 = vsyncpa [#allocation4 + $0x1], 0  ;;  %s1232_s12 = smov 0   ;;  %s1234_s13 = smov 0  }
   0x8   :  { %s1236_s14 = smov 0   ;;  %s1238_s15 = smov 0  }
   0x9   :  { %s1240_s16 = smov 0   ;;  %s1242_s17 = smov 0  }
   0xa LB: > { %1720 = sst [smem:[#allocation12_spill]] %s1198_s16  ;;  %s1263_s18 = sadd.s32 4294967295, %s1202_s17   ;;  %s1202_s17 = sphi %s1242_s17, %s22_s17   ;;  %s1198_s16 = sphi %s1240_s16, %s1743_s16   ;;  %s1194_s15 = sphi %s1238_s15, %s1742_s15   ;;  %s1190_s14 = sphi %s1236_s14, %s1746_s14   ;;  %s1186_s13 = sphi %s1234_s13, %s1745_s13   ;;  %s1182_s12 = sphi %s1232_s12, %s1744_s12  }
   0xb   : > { %s908_s19 = sadd.s32 4294967294, %s1202_s17   ;;  %s34_s20 = sadd.s32 1, %s1198_s16 }
   0xc   : > { %s43_s21 = sadd.s32 1, %s1190_s14  ;;  %p36_p0 = scmp.ge.s32.totalorder %s34_s20, 2 }
   0xd   : > { %p50_p1 = scmp.ne.s32.totalorder %s1190_s14, %s1186_s13  ;;  %p51_p2 = scmp.eq.s32.totalorder %s1202_s17, 0 }
   0xe   : > { %p56_p3 = scmp.ne.s32.totalorder %s1186_s13, %s1182_s12  ;;  %s1748_s20 = smov (%p36_p0, %s34_s20), 0 }
   0xf   : > { %1721 = sst [smem:[#allocation13_spill]] %s1748_s20  ;;  %p1275_p4 = por %p51_p2, %p50_p1 }
  0x10   : > { %p57_p5 = scmp.eq.s32.totalorder %s1263_s18, 0  ;;  %s38_s23 = ssub.s32 %s1198_s16, %s1748_s20 }
  0x11   : > { %p134_p6 = scmp.eq.s32.totalorder %s1263_s18, 1  ;;  %p41_p7 = scmp.eq.s32.totalorder %s38_s23, 0 }
  0x12   : > { %p1283_p8 = por %p57_p5, %p56_p3  ;;  %p140_p10 = scmp.eq.s32.totalorder %s908_s19, 1 }
  0x13   : > { %p1287_p9 = por %p134_p6, %p50_p1  ;;  %p956_p13 = scmp.lt.s32.totalorder %s1202_s17, 2 }
  0x14   : > { %s1723_s24 = scalar_select %p1283_p8, 1, 0 }
  0x15   : > { %s1724_s25 = scalar_select %p1287_p9, 1, 0 }
  0x16   : > { %s1292_s26 = scalar_select %p41_p7, %s1190_s14, %s43_s21  }
  0x17   : > { %p1294_p11 = por %p140_p10, %p56_p3  ;;  %s1712_s28 = sand.u32 1, %s1190_s14  }
  0x18   : > { %1725 = sst [smem:[#allocation14_spill]] %s1292_s26  ;;  %s1303_s29 = sshll.u32 %s1712_s28, 4 }
  0x19   : > { %s1726_s27 = scalar_select %p1294_p11, 1, 0 }
  0x1a   : > { %s1306_s30 = sshll.u32 %s1198_s16, 8  ;;  %p1310_p0 = pnand %p956_p13, %p1275_p4 }
  0x1b   : > { %s183_s5 = sand.u32 1, %s1202_s17   ;;  %s1728_s1 = sld [smem:[#allocation15_spill]] }
  0x1c   : > { %s187_s9 = scalar_lea.vmem [#allocation5], %s1303_s29  ;;  %s1326_s11 = scalar_lea.sflag [#allocation6], %s183_s5 }
  0x1d   : > { %s194_s10 = sshll.u32 %s187_s9, 4  ;;  %p1332_p4 = pneg %p1310_p0  ;;  %s1323_s10 = int_to_ptr.vmem [resolvable:$true] %s194_s10 }
  0x21   : > { %s1319_s8 = scalar_lea.hbm %s1728_s1, %s1306_s30  ;;  %s1031_s6 = scalar_lea.hbm %s1728_s1, 512 }
  0x22   : > { %s1026_s19 = scalar_lea.hbm %s1319_s8, 256  ;;  %p1032_p7 = scmp.lt.u32.totalorder %s1319_s8, %s1728_s1 }
  0x23   : > { %p1027_p3 = scmp.ne.s32.totalorder %s1319_s8, %s1026_s19  ;;  %p1033_p10 = scmp.lt.u32.totalorder %s1031_s6, %s1026_s19 }
  0x24   : > { %p1035_p12 = scmp.lt.u32.totalorder %s1026_s19, %s1319_s8 }
  0x25   : > { %p1029_p5 = pnand %p1332_p4, %p1027_p3  ;;  %p1034_p13 = por %p1033_p10, %p1032_p7 }
  0x27   : > { %p1030_p6 = pneg %p1029_p5  ;;  %p1036_p1 = por %p1035_p12, %p1034_p13 }
  0x29   : > { %p1037_p2 = pnand %p1036_p1, %p1030_p6 }
  0x2b   : > { %1040 = shalt.err (!%p1037_p2)
}
  0x2c   : > { %s1041_s5 = scalar_lea.vmem %s1323_s10, 256  ;;  %s1204_s22 = smov [#allocation5]  }
  0x2d   : > { %p1042_p3 = scmp.ne.s32.totalorder %s1323_s10, %s1041_s5  ;;  %s1046_s23 = sshll.u32 %s1204_s22, 4  ;;  %s1047_s23 = int_to_ptr.vmem [resolvable:$false] %s1046_s23 }
  0x2e   : > { %s1048_s7 = scalar_lea.vmem %s1047_s23, 512  ;;  %p1049_p9 = scmp.lt.s32.totalorder %s1323_s10, %s1047_s23 }
  0x2f   : > { %p1044_p5 = pnand %p1042_p3, %p1332_p4  ;;  %p1050_p8 = scmp.lt.s32.totalorder %s1048_s7, %s1041_s5 }
  0x31   : > { %p1045_p11 = pneg %p1044_p5  ;;  %p1051_p7 = por %p1050_p8, %p1049_p9 }
  0x33   : > { %p1052_p10 = pnand %p1051_p7, %p1045_p11 }
  0x35   : > { %1055 = shalt.err (!%p1052_p10)
}
  0x36   : > { %s1713_s19 = smov 64   ;;  %s1715_s6 = smov 4  }
  0x37   : > { %948 = dma.hbm_to_vmem [thread:$0]  (!%p1310_p0), %s1319_s8, 256, %s1323_s10, %s1326_s11, %s1713_s19, %s1713_s19, %s1715_s6  }
  0x38   : > { %p1730_p8 = scmp.lt.s32.totalorder %s1202_s17, 3  ;;  %p1731_p9 = scmp.ge.s32.totalorder %s1202_s17, 1 }
  0x39   : > { %s1371_s23 = scalar_lea.hbm %s1706_s0, %s1306_s30  ;;  %s164_s7 = scalar_lea.vmem [#allocation2], %s1303_s29 }
  0x3a   : > { %p1363_p11 = pnand %p1731_p9, %p1730_p8  ;;  %s173_s28 = sshll.u32 %s164_s7, 4  ;;  %s1374_s28 = int_to_ptr.vmem [resolvable:$true] %s173_s28 }
  0x3b   : > { %s1380_s19 = scalar_lea.hbm %s1708_s2, %s1306_s30  ;;  %s1733_s6 = sand.u32 1, %s1190_s14  }
  0x3c   : > { %s1732_s9 = scalar_select %p1363_p11, 1, 0 }
  0x3d   : > { %s1384_s1 = scalar_lea.sflag [#allocation3], %s1733_s6  ;;  %s1056_s20 = scalar_lea.hbm %s1371_s23, 256 }
  0x3e   : > { %p1057_p12 = scmp.ne.s32.totalorder %s1371_s23, %s1056_s20  ;;  %s1061_s16 = scalar_lea.hbm %s1706_s0, 512 }
  0x3f   : > { %p1062_p6 = scmp.lt.u32.totalorder %s1371_s23, %s1706_s0  ;;  %p1063_p13 = scmp.lt.u32.totalorder %s1061_s16, %s1056_s20 }
  0x40   : > { %p1059_p1 = pnand %p1057_p12, %p1332_p4  ;;  %p1065_p5 = scmp.lt.u32.totalorder %s1056_s20, %s1371_s23 }
  0x41   : > { %p1064_p3 = por %p1063_p13, %p1062_p6 }
  0x42   : > { %p1060_p2 = pneg %p1059_p1 }
  0x43   : > { %p1066_p7 = por %p1065_p5, %p1064_p3 }
  0x45   : > { %p1067_p10 = pnand %p1066_p7, %p1060_p2 }
  0x47   : > { %1070 = shalt.err (!%p1067_p10)
}
  0x48   : > { %s1071_s30 = scalar_lea.vmem %s1374_s28, 256  ;;  %s1207_s6 = smov [#allocation2]  }
  0x49   : > { %p1072_p8 = scmp.ne.s32.totalorder %s1374_s28, %s1071_s30  ;;  %s1076_s8 = sshll.u32 %s1207_s6, 4  ;;  %s1077_s8 = int_to_ptr.vmem [resolvable:$false] %s1076_s8 }
  0x4a   : > { %s1078_s26 = scalar_lea.vmem %s1077_s8, 512  ;;  %p1079_p1 = scmp.lt.s32.totalorder %s1374_s28, %s1077_s8 }
  0x4b   : > { %p1074_p9 = pnand %p1072_p8, %p1332_p4  ;;  %p1080_p11 = scmp.lt.s32.totalorder %s1078_s26, %s1071_s30 }
  0x4d   : > { %p1075_p12 = pneg %p1074_p9  ;;  %p1081_p6 = por %p1080_p11, %p1079_p1 }
  0x4f   : > { %p1082_p13 = pnand %p1081_p6, %p1075_p12 }
  0x51   : > { %1085 = shalt.err (!%p1082_p13)
}
  0x52   : > { %s1734_s16 = smov 4   ;;  %s1735_s20 = smov 64  }
  0x53   : > { %945 = dma.hbm_to_vmem [thread:$0]  (!%p1310_p0), %s1371_s23, 256, %s1374_s28, %s1384_s1, %s1735_s20, %s1735_s20, %s1734_s16  }
  0x54   : > { %s208_s10 = scalar_lea.vmem [#allocation7], %s1303_s29  ;;  %s1086_s22 = scalar_lea.hbm %s1380_s19, 256 }
  0x55   : > { %s215_s5 = sshll.u32 %s208_s10, 4  ;;  %p1087_p11 = scmp.ne.s32.totalorder %s1380_s19, %s1086_s22  ;;  %s1412_s5 = int_to_ptr.vmem [resolvable:$true] %s215_s5 }
  0x56   : > { %s1091_s6 = scalar_lea.hbm %s1708_s2, 512  ;;  %p1092_p5 = scmp.lt.u32.totalorder %s1380_s19, %s1708_s2 }
  0x57   : > { %p1089_p2 = pnand %p1087_p11, %p1332_p4  ;;  %p1093_p7 = scmp.lt.u32.totalorder %s1091_s6, %s1086_s22 }
  0x58   : > { %p1095_p8 = scmp.lt.u32.totalorder %s1086_s22, %s1380_s19 }
  0x59   : > { %p1090_p3 = pneg %p1089_p2  ;;  %p1094_p10 = por %p1093_p7, %p1092_p5 }
  0x5b   : > { %p1096_p9 = por %p1095_p8, %p1094_p10 }
  0x5d   : > { %p1097_p12 = pnand %p1096_p9, %p1090_p3 }
  0x5f   : > { %1100 = shalt.err (!%p1097_p12)
}
  0x60   : > { %s1101_s1 = scalar_lea.vmem %s1412_s5, 256  ;;  %s1208_s28 = smov [#allocation7]  }
  0x61   : > { %p1102_p1 = scmp.ne.s32.totalorder %s1412_s5, %s1101_s1  ;;  %s1106_s29 = sshll.u32 %s1208_s28, 4  ;;  %s1107_s29 = int_to_ptr.vmem [resolvable:$false] %s1106_s29 }
  0x62   : > { %s1108_s23 = scalar_lea.vmem %s1107_s29, 512  ;;  %p1109_p11 = scmp.lt.s32.totalorder %s1412_s5, %s1107_s29 }
  0x63   : > { %p1104_p6 = pnand %p1102_p1, %p1332_p4  ;;  %p1110_p2 = scmp.lt.s32.totalorder %s1108_s23, %s1101_s1 }
  0x65   : > { %p1105_p13 = pneg %p1104_p6  ;;  %p1111_p5 = por %p1110_p2, %p1109_p11 }
  0x67   : > { %p1112_p7 = pnand %p1111_p5, %p1105_p13 }
  0x69   : > { %1115 = shalt.err (!%p1112_p7)
}
  0x6a   : > { %951 = dma.hbm_to_vmem [thread:$0]  (!%p1310_p0), %s1380_s19, 256, %s1412_s5, %s1326_s11, %s1735_s20, %s1735_s20, %s1734_s16  }
  0x6b   : > { %p1736_p4 = scmp.ne.s32.totalorder %s1732_s9, 0 }
  0x6c   : > { %s1442_s21 = sand.u32 (!%p1736_p4), 1, %s1186_s13   ;;  %p1737_p3 = scmp.ne.s32.totalorder (!%p1736_p4), %s1723_s24, 0 }
  0x6d   : > { %227 = sbr.rel (%p1736_p4) target bundleno = 239 (0xef), region = 32  ;;  %s1445_s10 = sshll.u32 (!%p1736_p4), %s1442_s21, 4 }
  0x6e   : > { %s230_s4 = scalar_lea.sflag (!%p1736_p4), [#allocation3], %s1442_s21  ;;  %s1449_s22 = scalar_lea.vmem (!%p1736_p4), [#allocation2], %s1445_s10 }
  0x74   : > { %1169 = dma.done.wait (%p1737_p3), %s230_s4, 256  }
  0x75   : > { %1171 = vsyncadd (%p1737_p3), %s230_s4, 4294967040  ;;  %s238_s11 = sand.u32 1, %s1263_s18   ;;  %s1457_s9 = scalar_lea.vmem [#allocation5], %s1445_s10 }
  0x76   : > { %s239_s19 = scalar_lea.sflag [#allocation6], %s238_s11 }
  0x77   : > { %1173 = dma.done.wait (%p1737_p3), %s239_s19, 512  }
  0x78   : > { %1175 = vsyncadd (%p1737_p3), %s239_s19, 4294966784  ;;  %v298_v0 = vlaneseq  ;;  %v286_v3 = vld [vmem:[%s1449_s22] sm:$0x1]  ;;  %v287_v4 = vld [vmem:[%s1449_s22 + $0x4] sm:$0x1]  ;;  %vm319_vm0 = vcmask 1041409  }
  0x79   : > { %v288_v5 = vld [vmem:[%s1449_s22 + $0x8] sm:$0x1]  ;;  %v289_v6 = vld [vmem:[%s1449_s22 + $0xc] sm:$0x1]  ;;  %v290_v7 = vmul.f32 0.5, %v286_v3  ;;  %v291_v8 = vmul.f32 0.5, %v287_v4 }
  0x7a   : > { %v299_v1 = vshrl.u32 %v298_v0, 7  ;;  %v292_v9 = vmul.f32 0.5, %v288_v5  ;;  %v294_v10 = vld [vmem:[%s1457_s9] sm:$0x1]  ;;  %v295_v11 = vld [vmem:[%s1457_s9 + $0x4] sm:$0x1] }
  0x7b   : > { %vm322_vm1 = vcmask 1042434   ;;  %vm325_vm2 = vcmask 1043459   ;;  %v293_v12 = vmul.f32 0.5, %v289_v6  ;;  %v296_v13 = vld [vmem:[%s1457_s9 + $0x8] sm:$0x1]  ;;  %v318_v16 = vrot.slane %v295_v11, 7 }
  0x7c   : > { %v1463_v2 = vsub.s32 0, %v299_v1  ;;  %v297_v14 = vld [vmem:[%s1457_s9 + $0xc] sm:$0x1]  ;;  %v321_v19 = vrot.slane %v296_v13, 6  ;;  %v336_v21 = vld [vmem:[%s1449_s22 + $0x1] sm:$0x1] }
  0x7d   : > { %v324_v20 = vrot.slane %v297_v14, 5  ;;  %v337_v22 = vld [vmem:[%s1449_s22 + $0x5] sm:$0x1]  ;;  %v320_v23 = vsel %vm319_vm0, %v318_v16, %v294_v10  ;;  %v338_v24 = vld [vmem:[%s1449_s22 + $0x9] sm:$0x1]  ;;  %v340_v26 = vmul.f32 0.5, %v336_v21 }
  0x7e   : > { %v301_v15 = vrot.slane %v290_v7, %v1463_v2  ;;  %v305_v17 = vrot.slane %v291_v8, %v1463_v2  ;;  %v309_v18 = vrot.slane %v292_v9, %v1463_v2  ;;  %v339_v25 = vld [vmem:[%s1449_s22 + $0xd] sm:$0x1]  ;;  %v341_v27 = vmul.f32 0.5, %v337_v22  ;;  %v344_v31 = vld [vmem:[%s1457_s9 + $0x1] sm:$0x1]  ;;  %s1530_s18 = scalar_lea.vmem [#allocation7], %s1445_s10 }
  0x7f   : > { %v323_v28 = vsel %vm322_vm1, %v321_v19, %v320_v23  ;;  %v342_v29 = vmul.f32 0.5, %v338_v24  ;;  %v343_v30 = vmul.f32 0.5, %v339_v25  ;;  %v345_v32 = vld [vmem:[%s1457_s9 + $0x5] sm:$0x1]  ;;  %v313_v33 = vrot.slane %v293_v12, %v1463_v2  ;;  %v346_v35 = vld [vmem:[%s1457_s9 + $0x9] sm:$0x1] }
  0x80   : > { %v326_v34 = vsel %vm325_vm2, %v324_v20, %v323_v28  ;;  %v347_v36 = vld [vmem:[%s1457_s9 + $0xd] sm:$0x1]  ;;  %v351_v37 = vrot.slane %v340_v26, %v1463_v2  ;;  %v368_v38 = vrot.slane %v345_v32, 7  ;;  %v355_v42 = vrot.slane %v341_v27, %v1463_v2  ;;  %v383_v43 = vld [vmem:[%s1449_s22 + $0x2] sm:$0x1]  ;;  %s933_s24 = sshll.u32 %s1194_s15, 8 }
  0x81   : > { %v328_v39 = vmul.f32 %v326_v34, %v301_v15  ;;  %v329_v40 = vmul.f32 %v326_v34, %v305_v17  ;;  %v330_v41 = vmul.f32 %v326_v34, %v309_v18  ;;  %v384_v44 = vld [vmem:[%s1449_s22 + $0x6] sm:$0x1]  ;;  %v385_v45 = vld [vmem:[%s1449_s22 + $0xa] sm:$0x1]  ;;  %v359_v46 = vrot.slane %v342_v29, %v1463_v2  ;;  %v386_v50 = vld [vmem:[%s1449_s22 + $0xe] sm:$0x1]  ;;  %s1655_s7 = scalar_lea.hbm %s1709_s3, %s933_s24 }
  0x82   : > { %v363_v47 = vrot.slane %v343_v30, %v1463_v2  ;;  %v369_v48 = vsel %vm319_vm0, %v368_v38, %v344_v31  ;;  %v370_v49 = vrot.slane %v346_v35, 6  ;;  %v391_v51 = vld [vmem:[%s1457_s9 + $0x2] sm:$0x1]  ;;  %v372_v52 = vrot.slane %v347_v36, 5  ;;  %v392_v56 = vld [vmem:[%s1457_s9 + $0x6] sm:$0x1] }
  0x83   : > { %v387_v53 = vmul.f32 0.5, %v383_v43  ;;  %v388_v54 = vmul.f32 0.5, %v384_v44  ;;  %v389_v55 = vmul.f32 0.5, %v385_v45  ;;  %v331_v57 = vmul.f32 %v326_v34, %v313_v33  ;;  %v393_v60 = vld [vmem:[%s1457_s9 + $0xa] sm:$0x1]  ;;  %s283_s16 = scalar_lea.vmem [#allocation8], %s1445_s10 }
  0x84   : > { %v371_v58 = vsel %vm322_vm1, %v370_v49, %v369_v48  ;;  %v390_v59 = vmul.f32 0.5, %v386_v50  ;;  %v394_v61 = vld [vmem:[%s1457_s9 + $0xe] sm:$0x1]  ;;  %v415_v62 = vrot.slane %v392_v56, 7  ;;  %v430_v4 = vld [vmem:[%s1449_s22 + $0x3] sm:$0x1] }
  0x85   : > { %v373_v63 = vsel %vm325_vm2, %v372_v52, %v371_v58  ;;  %v398_v0 = vrot.slane %v387_v53, %v1463_v2  ;;  %v402_v1 = vrot.slane %v388_v54, %v1463_v2  ;;  %v406_v3 = vrot.slane %v389_v55, %v1463_v2  ;;  %v431_v9 = vld [vmem:[%s1449_s22 + $0x7] sm:$0x1]  ;;  %v432_v10 = vld [vmem:[%s1449_s22 + $0xb] sm:$0x1]  ;;  %v433_v11 = vld [vmem:[%s1449_s22 + $0xf] sm:$0x1] }
  0x86   : > { %v375_v5 = vmul.f32 %v373_v63, %v351_v37  ;;  %v376_v6 = vmul.f32 %v373_v63, %v355_v42  ;;  %v377_v7 = vmul.f32 %v373_v63, %v359_v46  ;;  %v378_v8 = vmul.f32 %v373_v63, %v363_v47  ;;  %v439_v16 = vld [vmem:[%s1457_s9 + $0x7] sm:$0x1]  ;;  %v440_v17 = vld [vmem:[%s1457_s9 + $0xb] sm:$0x1]  ;;  %v438_v34 = vld [vmem:[%s1457_s9 + $0x3] sm:$0x1] }
  0x87   : > { %v410_v12 = vrot.slane %v390_v59, %v1463_v2  ;;  %v416_v13 = vsel %vm319_vm0, %v415_v62, %v391_v51  ;;  %v417_v14 = vrot.slane %v393_v60, 6  ;;  %v419_v15 = vrot.slane %v394_v61, 5  ;;  %v441_v35 = vld [vmem:[%s1457_s9 + $0xf] sm:$0x1]  ;;  %s777_s20 = sshll.u32 %s283_s16, 4  ;;  %s762_s30 = scalar_lea.sflag [#allocation4], %s1442_s21  ;;  %s1657_s20 = int_to_ptr.vmem [resolvable:$true] %s777_s20 }
  0x88   : > { %v379_v18 = vadd.f32 %v375_v5, %v328_v39  ;;  %v380_v19 = vadd.f32 %v376_v6, %v329_v40  ;;  %v381_v20 = vadd.f32 %v377_v7, %v330_v41  ;;  %v382_v21 = vadd.f32 %v378_v8, %v331_v57  ;;  %s1116_s6 = scalar_lea.vmem %s1657_s20, 256  ;;  %p1738_p10 = scmp.ne.s32.totalorder %s1724_s25, 0 }
  0x89   : > { %v418_v22 = vsel %vm322_vm1, %v417_v14, %v416_v13  ;;  %v434_v23 = vmul.f32 0.5, %v430_v4  ;;  %v435_v24 = vmul.f32 0.5, %v431_v9  ;;  %v436_v25 = vmul.f32 0.5, %v432_v10  ;;  %p1117_p0 = scmp.ne.s32.totalorder %s1657_s20, %s1116_s6  ;;  %s1209_s8 = smov [#allocation8]  }
  0x8a   : > { %v420_v26 = vsel %vm325_vm2, %v419_v15, %v418_v22  ;;  %v437_v27 = vmul.f32 0.5, %v433_v11  ;;  %v462_v28 = vrot.slane %v439_v16, 7  ;;  %v464_v29 = vrot.slane %v440_v17, 6  ;;  %s1120_s26 = sshll.u32 %s1209_s8, 4  ;;  %s1121_s26 = int_to_ptr.vmem [resolvable:$false] %s1120_s26 }
  0x8b   : > { %v422_v30 = vmul.f32 %v420_v26, %v398_v0  ;;  %v423_v31 = vmul.f32 %v420_v26, %v402_v1  ;;  %v424_v32 = vmul.f32 %v420_v26, %v406_v3  ;;  %v425_v33 = vmul.f32 %v420_v26, %v410_v12  ;;  %p1118_p8 = pnand %p1117_p0, %p1738_p10  ;;  %s1122_s1 = scalar_lea.vmem %s1121_s26, 512 }
  0x8c   : > { %v445_v36 = vrot.slane %v434_v23, %v1463_v2  ;;  %v449_v37 = vrot.slane %v435_v24, %v1463_v2  ;;  %v453_v38 = vrot.slane %v436_v25, %v1463_v2  ;;  %v457_v39 = vrot.slane %v437_v27, %v1463_v2  ;;  %v552_v25 = vld [vmem:[%s1530_s18 + $0x8] sm:$0x1]  ;;  %v598_v27 = vld [vmem:[%s1530_s18 + $0x5] sm:$0x1]  ;;  %p1123_p12 = scmp.lt.s32.totalorder %s1657_s20, %s1121_s26  ;;  %p1124_p1 = scmp.lt.s32.totalorder %s1122_s1, %s1116_s6 }
  0x8d   : > { %v426_v40 = vadd.f32 %v422_v30, %v379_v18  ;;  %v463_v41 = vsel %vm319_vm0, %v462_v28, %v438_v34  ;;  %v466_v42 = vrot.slane %v441_v35, 5  ;;  %v427_v43 = vadd.f32 %v423_v31, %v380_v19  ;;  %v645_v28 = vld [vmem:[%s1530_s18 + $0x6] sm:$0x1]  ;;  %v553_v34 = vld [vmem:[%s1530_s18 + $0xc] sm:$0x1]  ;;  %p1119_p9 = pneg %p1118_p8 }
  0x8e   : > { %v428_v44 = vadd.f32 %v424_v32, %v381_v20  ;;  %v429_v45 = vadd.f32 %v425_v33, %v382_v21  ;;  %v465_v46 = vsel %vm322_vm1, %v464_v29, %v463_v41  ;;  %vm477_vm3 = vcmask 1043456   ;;  %v551_v20 = vld [vmem:[%s1530_s18 + $0x4] sm:$0x1]  ;;  %v550_v33 = vld [vmem:[%s1530_s18] sm:$0x1]  ;;  %p1125_p6 = por %p1124_p1, %p1123_p12 }
  0x8f   : > { %v467_v47 = vsel %vm325_vm2, %v466_v42, %v465_v46  ;;  %v558_v26 = vrot.slane %v551_v20, 7  ;;  %v599_v35 = vld [vmem:[%s1530_s18 + $0x9] sm:$0x1]  ;;  %v644_v42 = vld [vmem:[%s1530_s18 + $0x2] sm:$0x1]  ;;  %v562_v46 = vrot.slane %v553_v34, 5 }
  0x90   : > { %v469_v48 = vmul.f32 %v467_v47, %v445_v36  ;;  %v470_v49 = vmul.f32 %v467_v47, %v449_v37  ;;  %v471_v50 = vmul.f32 %v467_v47, %v453_v38  ;;  %v472_v51 = vmul.f32 %v467_v47, %v457_v39  ;;  %v597_v38 = vld [vmem:[%s1530_s18 + $0x1] sm:$0x1]  ;;  %v646_v39 = vld [vmem:[%s1530_s18 + $0xa] sm:$0x1]  ;;  %p1126_p13 = pnand %p1125_p6, %p1119_p9 }
  0x91   : > { %v605_v36 = vrot.slane %v598_v27, 7  ;;  %v560_v37 = vrot.slane %v552_v25, 6  ;;  %v559_v41 = vsel %vm319_vm0, %v558_v26, %v550_v33  ;;  %vm738_vm4 = vcmask 1040384  }
  0x92   : > { %v473_v52 = vadd.f32 %v469_v48, %v426_v40  ;;  %v474_v53 = vadd.f32 %v470_v49, %v427_v43  ;;  %v475_v54 = vadd.f32 %v471_v50, %v428_v44  ;;  %v476_v2 = vadd.f32 %v472_v51, %v429_v45  ;;  %v692_v43 = vld [vmem:[%s1530_s18 + $0x7] sm:$0x1]  ;;  %v600_v44 = vld [vmem:[%s1530_s18 + $0xd] sm:$0x1]  ;;  %v647_v48 = vld [vmem:[%s1530_s18 + $0xe] sm:$0x1] }
  0x93   : > { %v652_v40 = vrot.slane %v645_v28, 7  ;;  %v607_v45 = vrot.slane %v599_v35, 6  ;;  %v606_v47 = vsel %vm319_vm0, %v605_v36, %v597_v38  ;;  %v654_v49 = vrot.slane %v646_v39, 6 }
  0x94   : > { %v478_v55 = vsel %vm477_vm3, %v473_v52, -inf  ;;  %v485_v56 = vsel %vm477_vm3, %v474_v53, -inf  ;;  %v492_v57 = vsel %vm477_vm3, %v475_v54, -inf  ;;  %v499_v58 = vsel %vm477_vm3, %v476_v2, -inf }
  0x95   : > { %v479_v59 = vrot.slane %v478_v55, 4  ;;  %v486_v60 = vrot.slane %v485_v56, 4  ;;  %v493_v61 = vrot.slane %v492_v57, 4  ;;  %v500_v62 = vrot.slane %v499_v58, 4 }
  0x96   : > { %v561_v50 = vsel %vm322_vm1, %v560_v37, %v559_v41  ;;  %v653_v51 = vsel %vm319_vm0, %v652_v40, %v644_v42  ;;  %vm743_vm5 = vcmask 1041408   ;;  %vm748_vm6 = vcmask 1042432  }
  0x97   : > { %v480_v63 = vmax.f32 %v478_v55, %v479_v59  ;;  %v487_v0 = vmax.f32 %v485_v56, %v486_v60  ;;  %v494_v1 = vmax.f32 %v492_v57, %v493_v61  ;;  %v501_v3 = vmax.f32 %v499_v58, %v500_v62  ;;  %v1555_v59 = vld [vmem:[%s1530_s18 + $0xf] sm:$0x1] }
  0x98   : > { %v608_v55 = vsel %vm322_vm1, %v607_v45, %v606_v47  ;;  %v656_v56 = vrot.slane %v647_v48, 5  ;;  %v563_v57 = vsel %vm325_vm2, %v562_v46, %v561_v50  ;;  %v655_v58 = vsel %vm322_vm1, %v654_v49, %v653_v51 }
  0x99   : > { %v481_v4 = vrot.slane %v480_v63, 2  ;;  %v488_v5 = vrot.slane %v487_v0, 2  ;;  %v495_v6 = vrot.slane %v494_v1, 2  ;;  %v502_v7 = vrot.slane %v501_v3, 2 }
  0x9b   : > { %v482_v8 = vmax.f32 %v480_v63, %v481_v4  ;;  %v489_v9 = vmax.f32 %v487_v0, %v488_v5  ;;  %v496_v10 = vmax.f32 %v494_v1, %v495_v6  ;;  %v503_v11 = vmax.f32 %v501_v3, %v502_v7 }
  0x9c   : > { %v1569_v4 = vsel %vm325_vm2, %v656_v56, %v655_v58  ;;  %v703_v5 = vrot.slane %v1555_v59, 5 }
  0x9d   : > { %v483_v12 = vrot.slane %v482_v8, 1  ;;  %v490_v13 = vrot.slane %v489_v9, 1  ;;  %v497_v14 = vrot.slane %v496_v10, 1  ;;  %v504_v15 = vrot.slane %v503_v11, 1 }
  0x9f   : > { %v484_v16 = vmax.f32 %v482_v8, %v483_v12  ;;  %v491_v17 = vmax.f32 %v489_v9, %v490_v13  ;;  %v498_v18 = vmax.f32 %v496_v10, %v497_v14  ;;  %v505_v19 = vmax.f32 %v503_v11, %v504_v15 }
  0xa1   : > { %v506_v21 = vsub.f32 %v473_v52, %v484_v16  ;;  %v507_v22 = vsub.f32 %v474_v53, %v491_v17  ;;  %v508_v23 = vsub.f32 %v475_v54, %v498_v18  ;;  %v509_v24 = vsub.f32 %v476_v2, %v505_v19  ;;  %v693_v52 = vld [vmem:[%s1530_s18 + $0xb] sm:$0x1]  ;;  %v691_v2 = vld [vmem:[%s1530_s18 + $0x3] sm:$0x1] }
  0xa2   : > { %v699_v53 = vrot.slane %v692_v43, 7  ;;  %v609_v54 = vrot.slane %v600_v44, 5  ;;  %v701_v60 = vrot.slane %v693_v52, 6 }
  0xa3   : > { %v510_v29 = vmul.f32 1.442695, %v506_v21  ;;  %v512_v30 = vmul.f32 1.442695, %v507_v22  ;;  %v514_v31 = vmul.f32 1.442695, %v508_v23 }
  0xa4   : > { %v516_v32 = vmul.f32 1.442695, %v509_v24  ;;  %v700_v61 = vsel %vm319_vm0, %v699_v53, %v691_v2  ;;  %v1561_v63 = vsel %vm325_vm2, %v609_v54, %v608_v55 }
  0xa5   : > { %1010 = vpow2.f32 %v510_v29  ;;  %v702_v10 = vsel %vm322_vm1, %v701_v60, %v700_v61 }
  0xa6   : > { %1012 = vpow2.f32 %v512_v30  ;;  %v1597_v59 = vsel %vm325_vm2, %v703_v5, %v702_v10 }
  0xa7   : > { %1014 = vpow2.f32 %v514_v31 }
  0xa8   : > { %1016 = vpow2.f32 %v516_v32 }
  0xaf   : > { %v1558_v62 = vpop.eup %1010 }
  0xb0   : > { %v1563_v0 = vpop.eup %1012  ;;  %v518_v1 = vsel %vm477_vm3, %v1558_v62, 0.0  ;;  %v565_v3 = vmul.f32 %v1558_v62, %v563_v57  ;;  %v612_v54 = vmul.f32 %v1558_v62, %v1561_v63  ;;  %v659_v58 = vmul.f32 %v1558_v62, %v1569_v4 }
  0xb1   : > { %v1572_v6 = vpop.eup %1014  ;;  %v519_v7 = vrot.slane %v518_v1, 4  ;;  %v525_v8 = vsel %vm477_vm3, %v1563_v0, 0.0  ;;  %v566_v9 = vmul.f32 %v1563_v0, %v563_v57  ;;  %v613_v55 = vmul.f32 %v1563_v0, %v1561_v63 }
  0xb2   : > { %v1578_v11 = vpop.eup %1016  ;;  %v526_v12 = vrot.slane %v525_v8, 4  ;;  %v532_v13 = vsel %vm477_vm3, %v1572_v6, 0.0  ;;  %v567_v14 = vmul.f32 %v1572_v6, %v563_v57  ;;  %v569_v15 = vsel %vm477_vm3, %v565_v3, 0.0 }
  0xb3   : > { %v520_v16 = vadd.f32 %v519_v7, %v518_v1  ;;  %v533_v17 = vrot.slane %v532_v13, 4  ;;  %v539_v18 = vsel %vm477_vm3, %v1578_v11, 0.0  ;;  %v568_v19 = vmul.f32 %v1578_v11, %v563_v57 }
  0xb4   : > { %v527_v20 = vadd.f32 %v526_v12, %v525_v8  ;;  %v540_v21 = vrot.slane %v539_v18, 4  ;;  %v570_v22 = vrot.slane %v569_v15, 4  ;;  %v576_v23 = vsel %vm477_vm3, %v566_v9, 0.0 }
  0xb5   : > { %v521_v24 = vrot.slane %v520_v16, 2  ;;  %v534_v25 = vadd.f32 %v533_v17, %v532_v13  ;;  %v577_v26 = vrot.slane %v576_v23, 4  ;;  %v583_v27 = vsel %vm477_vm3, %v567_v14, 0.0 }
  0xb6   : > { %v528_v28 = vrot.slane %v527_v20, 2  ;;  %v541_v29 = vadd.f32 %v540_v21, %v539_v18  ;;  %v571_v30 = vadd.f32 %v570_v22, %v569_v15  ;;  %v584_v31 = vrot.slane %v583_v27, 4 }
  0xb7   : > { %v522_v32 = vadd.f32 %v521_v24, %v520_v16  ;;  %v535_v33 = vrot.slane %v534_v25, 2  ;;  %v578_v34 = vadd.f32 %v577_v26, %v576_v23  ;;  %v590_v35 = vsel %vm477_vm3, %v568_v19, 0.0 }
  0xb8   : > { %v529_v36 = vadd.f32 %v528_v28, %v527_v20  ;;  %v542_v37 = vrot.slane %v541_v29, 2  ;;  %v572_v38 = vrot.slane %v571_v30, 2  ;;  %v585_v39 = vadd.f32 %v584_v31, %v583_v27 }
  0xb9   : > { %v523_v40 = vrot.slane %v522_v32, 1  ;;  %v536_v41 = vadd.f32 %v535_v33, %v534_v25  ;;  %v579_v42 = vrot.slane %v578_v34, 2  ;;  %v591_v43 = vrot.slane %v590_v35, 4 }
  0xba   : > { %v530_v44 = vrot.slane %v529_v36, 1  ;;  %v543_v45 = vadd.f32 %v542_v37, %v541_v29  ;;  %v573_v46 = vadd.f32 %v572_v38, %v571_v30  ;;  %v586_v47 = vrot.slane %v585_v39, 2 }
  0xbb   : > { %v524_v48 = vadd.f32 %v523_v40, %v522_v32  ;;  %v537_v49 = vrot.slane %v536_v41, 1  ;;  %v580_v50 = vadd.f32 %v579_v42, %v578_v34  ;;  %v592_v51 = vadd.f32 %v591_v43, %v590_v35 }
  0xbc   : > { %v531_v52 = vadd.f32 %v530_v44, %v529_v36  ;;  %v544_v53 = vrot.slane %v543_v45, 1  ;;  %v574_v2 = vrot.slane %v573_v46, 1  ;;  %v587_v57 = vadd.f32 %v586_v47, %v585_v39 }
  0xbd   : > { %v538_v56 = vadd.f32 %v537_v49, %v536_v41  ;;  %1018 = vrcp.f32 %v524_v48  ;;  %v581_v60 = vrot.slane %v580_v50, 1  ;;  %v593_v61 = vrot.slane %v592_v51, 2 }
  0xbe   : > { %v614_v1 = vmul.f32 %v1572_v6, %v1561_v63  ;;  %v545_v3 = vadd.f32 %v544_v53, %v543_v45  ;;  %1020 = vrcp.f32 %v531_v52  ;;  %v615_v7 = vmul.f32 %v1578_v11, %v1561_v63 }
  0xbf   : > { %v616_v8 = vsel %vm477_vm3, %v612_v54, 0.0  ;;  %v1604_v9 = vadd.f32 %v574_v2, %v573_v46  ;;  %v623_v13 = vsel %vm477_vm3, %v613_v55, 0.0  ;;  %v660_v16 = vmul.f32 %v1563_v0, %v1569_v4 }
  0xc0   : > { %v617_v12 = vrot.slane %v616_v8, 4  ;;  %v630_v5 = vsel %vm477_vm3, %v614_v1, 0.0  ;;  %v624_v10 = vrot.slane %v623_v13, 4  ;;  %v637_v15 = vsel %vm477_vm3, %v615_v7, 0.0 }
  0xc1   : > { %v631_v14 = vrot.slane %v630_v5, 4  ;;  %v594_v17 = vadd.f32 %v593_v61, %v592_v51  ;;  %v638_v19 = vrot.slane %v637_v15, 4  ;;  %v661_v63 = vmul.f32 %v1572_v6, %v1569_v4 }
  0xc2   : > { %v618_v18 = vadd.f32 %v617_v12, %v616_v8  ;;  %v625_v20 = vadd.f32 %v624_v10, %v623_v13  ;;  %v662_v22 = vmul.f32 %v1578_v11, %v1569_v4  ;;  %v663_v23 = vsel %vm477_vm3, %v659_v58, 0.0 }
  0xc3   : > { %v632_v21 = vadd.f32 %v631_v14, %v630_v5  ;;  %v639_v25 = vadd.f32 %v638_v19, %v637_v15  ;;  %v664_v26 = vrot.slane %v663_v23, 4  ;;  %v670_v27 = vsel %vm477_vm3, %v660_v16, 0.0 }
  0xc4   : > { %v619_v24 = vrot.slane %v618_v18, 2  ;;  %v626_v28 = vrot.slane %v625_v20, 2  ;;  %v671_v30 = vrot.slane %v670_v27, 4  ;;  %v677_v31 = vsel %vm477_vm3, %v661_v63, 0.0 }
  0xc5   : > { %v633_v29 = vrot.slane %v632_v21, 2  ;;  %v588_v32 = vrot.slane %v587_v57, 1  ;;  %v640_v33 = vrot.slane %v639_v25, 2  ;;  %v665_v34 = vadd.f32 %v664_v26, %v663_v23 }
  0xc6   : > { %v678_v35 = vrot.slane %v677_v31, 4  ;;  %1022 = vrcp.f32 %v538_v56  ;;  %v595_v36 = vrot.slane %v594_v17, 1  ;;  %v672_v37 = vadd.f32 %v671_v30, %v670_v27 }
  0xc7   : > { %v684_v4 = vsel %vm477_vm3, %v662_v22, 0.0  ;;  %v1619_v38 = vpop.eup %1018  ;;  %v620_v39 = vadd.f32 %v619_v24, %v618_v18  ;;  %v627_v40 = vadd.f32 %v626_v28, %v625_v20  ;;  %v666_v41 = vrot.slane %v665_v34, 2 }
  0xc8   : > { %v679_v42 = vadd.f32 %v678_v35, %v677_v31  ;;  %v1621_v43 = vpop.eup %1020  ;;  %v582_v44 = vadd.f32 %v581_v60, %v580_v50  ;;  %v634_v45 = vadd.f32 %v633_v29, %v632_v21  ;;  %v673_v46 = vrot.slane %v672_v37, 2 }
  0xc9   : > { %v685_v47 = vrot.slane %v684_v4, 4  ;;  %1024 = vrcp.f32 %v545_v3  ;;  %v641_v48 = vadd.f32 %v640_v33, %v639_v25  ;;  %v667_v49 = vadd.f32 %v666_v41, %v665_v34 }
  0xca   : > { %v680_v51 = vrot.slane %v679_v42, 2  ;;  %v589_v52 = vadd.f32 %v588_v32, %v587_v57  ;;  %v596_v53 = vadd.f32 %v595_v36, %v594_v17  ;;  %v674_v54 = vadd.f32 %v673_v46, %v672_v37 }
  0xcb   : > { %v686_v2 = vadd.f32 %v685_v47, %v684_v4  ;;  %v621_v55 = vrot.slane %v620_v39, 1  ;;  %v628_v56 = vrot.slane %v627_v40, 1  ;;  %v706_v61 = vmul.f32 %v1558_v62, %v1597_v59 }
  0xcc   : > { %v681_v58 = vadd.f32 %v680_v51, %v679_v42  ;;  %v635_v1 = vrot.slane %v634_v45, 1  ;;  %v707_v60 = vmul.f32 %v1563_v0, %v1597_v59  ;;  %v708_v3 = vmul.f32 %v1572_v6, %v1597_v59 }
  0xcd   : > { %v687_v50 = vrot.slane %v686_v2, 2  ;;  %v642_v7 = vrot.slane %v641_v48, 1  ;;  %v668_v57 = vrot.slane %v667_v49, 1  ;;  %v709_v8 = vmul.f32 %v1578_v11, %v1597_v59 }
  0xce   : > { %v710_v12 = vsel %vm477_vm3, %v706_v61, 0.0  ;;  %v675_v13 = vrot.slane %v674_v54, 1  ;;  %v717_v62 = vsel %vm477_vm3, %v707_v60, 0.0  ;;  %v682_v14 = vrot.slane %v681_v58, 1 }
  0xcf   : > { %v688_v5 = vadd.f32 %v687_v50, %v686_v2  ;;  %v711_v10 = vrot.slane %v710_v12, 4  ;;  %v718_v15 = vrot.slane %v717_v62, 4  ;;  %v724_v0 = vsel %vm477_vm3, %v708_v3, 0.0 }
  0xd0   : > { %v731_v16 = vsel %vm477_vm3, %v709_v8, 0.0  ;;  %v1023_v6 = vpop.eup %1022  ;;  %v622_v17 = vadd.f32 %v621_v55, %v620_v39  ;;  %v725_v19 = vrot.slane %v724_v0, 4  ;;  %v629_v20 = vadd.f32 %v628_v56, %v627_v40 }
  0xd1   : > { %v712_v18 = vadd.f32 %v711_v10, %v710_v12  ;;  %v732_v63 = vrot.slane %v731_v16, 4  ;;  %v636_v11 = vadd.f32 %v635_v1, %v634_v45  ;;  %v689_v59 = vrot.slane %v688_v5, 1 }
  0xd2   : > { %v719_v21 = vadd.f32 %v718_v15, %v717_v62  ;;  %v643_v22 = vadd.f32 %v642_v7, %v641_v48  ;;  %v726_v24 = vadd.f32 %v725_v19, %v724_v0  ;;  %v669_v27 = vadd.f32 %v668_v57, %v667_v49 }
  0xd3   : > { %v713_v23 = vrot.slane %v712_v18, 2  ;;  %v733_v25 = vadd.f32 %v732_v63, %v731_v16  ;;  %v1025_v26 = vpop.eup %1024  ;;  %v676_v28 = vadd.f32 %v675_v13, %v674_v54  ;;  %v683_v29 = vadd.f32 %v682_v14, %v681_v58 }
  0xd4   : > { %v720_v30 = vrot.slane %v719_v21, 2  ;;  %v727_v32 = vrot.slane %v726_v24, 2  ;;  %v739_v34 = vsel %vm738_vm4, %v1604_v9, %v622_v17  ;;  %v690_v35 = vadd.f32 %v689_v59, %v688_v5 }
  0xd5   : > { %v714_v31 = vadd.f32 %v713_v23, %v712_v18  ;;  %v734_v33 = vrot.slane %v733_v25, 2  ;;  %v740_v37 = vsel %vm738_vm4, %v582_v44, %v629_v20  ;;  %v741_v4 = vsel %vm738_vm4, %v589_v52, %v636_v11 }
  0xd6   : > { %v721_v36 = vadd.f32 %v720_v30, %v719_v21  ;;  %v728_v40 = vadd.f32 %v727_v32, %v726_v24  ;;  %v742_v42 = vsel %vm738_vm4, %v596_v53, %v643_v22  ;;  %v744_v46 = vsel %vm743_vm5, %v739_v34, %v669_v27 }
  0xd7   : > { %v715_v39 = vrot.slane %v714_v31, 1  ;;  %v735_v41 = vadd.f32 %v734_v33, %v733_v25  ;;  %v745_v49 = vsel %vm743_vm5, %v740_v37, %v676_v28  ;;  %v746_v44 = vsel %vm743_vm5, %v741_v4, %v683_v29 }
  0xd8   : > { %v722_v45 = vrot.slane %v721_v36, 1  ;;  %v729_v48 = vrot.slane %v728_v40, 1  ;;  %v747_v52 = vsel %vm743_vm5, %v742_v42, %v690_v35 }
  0xd9   : > { %v716_v47 = vadd.f32 %v715_v39, %v714_v31  ;;  %v736_v9 = vrot.slane %v735_v41, 1 }
  0xda   : > { %v723_v51 = vadd.f32 %v722_v45, %v721_v36  ;;  %v730_v54 = vadd.f32 %v729_v48, %v728_v40 }
  0xdb   : > { %v737_v53 = vadd.f32 %v736_v9, %v735_v41  ;;  %v749_v2 = vsel %vm748_vm6, %v744_v46, %v716_v47 }
  0xdc   : > { %v750_v55 = vsel %vm748_vm6, %v745_v49, %v723_v51  ;;  %v753_v56 = vmul.f32 %v1619_v38, %v749_v2  ;;  %v751_v58 = vsel %vm748_vm6, %v746_v44, %v730_v54 }
  0xdd   : > { %v752_v61 = vsel %vm748_vm6, %v747_v52, %v737_v53  ;;  %v754_v1 = vmul.f32 %v1621_v43, %v750_v55  ;;  %v755_v50 = vmul.f32 %v1023_v6, %v751_v58 }
  0xde   : > { %v756_v60 = vmul.f32 %v1025_v26, %v752_v61  ;;  %757 = vst [vmem:[%s283_s16] sm:$0xf] %v753_v56 }
  0xdf   : > { %758 = vst [vmem:[%s283_s16 + $0x4] sm:$0xf] %v754_v1  ;;  %759 = vst [vmem:[%s283_s16 + $0x8] sm:$0xf] %v755_v50 }
  0xe0   : > { %760 = vst [vmem:[%s283_s16 + $0xc] sm:$0xf] %v756_v60 }
  0xe1   : > { %1129 = shalt.err (!%p1126_p13)
}
  0xe2   : > { %s1130_s28 = scalar_lea.hbm %s1655_s7, 256  ;;  %s1134_s10 = scalar_lea.hbm %s1709_s3, 512 }
  0xe3   : > { %p1131_p11 = scmp.ne.s32.totalorder %s1655_s7, %s1130_s28  ;;  %p1135_p7 = scmp.lt.u32.totalorder %s1655_s7, %s1709_s3 }
  0xe4   : > { %p1136_p4 = scmp.lt.u32.totalorder %s1134_s10, %s1130_s28  ;;  %p1138_p0 = scmp.lt.u32.totalorder %s1130_s28, %s1655_s7 }
  0xe5   : > { %p1132_p2 = pnand %p1131_p11, %p1738_p10 }
  0xe6   : > { %p1137_p3 = por %p1136_p4, %p1135_p7 }
  0xe7   : > { %p1133_p5 = pneg %p1132_p2 }
  0xe8   : > { %p1139_p8 = por %p1138_p0, %p1137_p3 }
  0xea   : > { %p1140_p9 = pnand %p1139_p8, %p1133_p5 }
  0xec   : > { %1143 = shalt.err (!%p1140_p9)
}
  0xed   : > { %s1210_s11 = smov 64   ;;  %s1211_s19 = smov 4  }
  0xee   : > { %940 = dma.vmem_to_hbm [thread:$0]  (%p1738_p10), %s1657_s20, 256, %s1655_s7, %s762_s30, %s1210_s11, %s1210_s11, %s1211_s19  }
  0xef PF: > { %s792_s9 = sand.u32 1, %s1182_s12   ;;  %p1739_p12 = scmp.ne.s32.totalorder %s1726_s27, 0 }
  0xf0   : > { %p1740_p1 = scmp.ge.s32.totalorder %s1202_s17, 2  ;;  %s793_s18 = scalar_lea.sflag [#allocation4], %s792_s9 }
  0xf2   : > { %p953_p6 = pnand %p1740_p1, %p1739_p12 }
  0xf4   : > { %1177 = dma.done.wait (!%p953_p6), %s793_s18, 256  }
  0xf5   : > { %1179 = vsyncadd (!%p953_p6), %s793_s18, 4294967040  ;;  %s22_s17 = sadd.s32 1, %s1202_s17   ;;  %s1741_s24 = sld [smem:[#allocation14_spill]] }
  0xf6   : > { %p19_p13 = scmp.ge.s32.totalorder %s22_s17, 4   ;;  %s1742_s15 = sld [smem:[#allocation12_spill]] }
  0xf7   : > { %s1743_s16 = sld [smem:[#allocation13_spill]]  ;;  %s1744_s12 = smov %s1186_s13 }
  0xf8   : > { %s1745_s13 = smov %s1190_s14  ;;  %21 = sbr.rel (!%p19_p13) target bundleno = 10 (0xa), region = 101 }
  0xfb   : > { %s1746_s14 = smov %s1741_s24 }
  0xff   :  { %798 = vsyncpa [#allocation3], 1 }
 0x100   :  { %800 = vsyncpa [#allocation3 + $0x1], 1 }
 0x101   :  { %801 = vsyncpa [#allocation6], 1 }
 0x102   :  { %803 = vsyncpa [#allocation6 + $0x1], 1 }
 0x103   :  { %804 = vsyncpa [#allocation4], 1 }
 0x104   :  { %806 = vsyncpa [#allocation4 + $0x1], 1 }

</bundles_post_ra>
